<compile_context>
chip_gen: v7x
topology: tpu7x:2x2x1
jax: 0.10.0
libtpu: 0.0.40
codegen_flags: <defaults>
</compile_context>

<pallas_src>
import jax
import jax.numpy as jnp
from jax.experimental import pallas as pl
from jax.experimental.pallas import tpu as pltpu


def _round_up(x, m):
    return (x + m - 1) // m * m


# ----------------------------------------------------------------------------
# Parameter initialization (plain-JAX glue, mirrors QR_init / add_new_task)
# ----------------------------------------------------------------------------
def qr_init(key, shape, old_params):
    """JAX port of QR_init: orthonormal init, orthogonal to previous tasks."""
    rows, cols = shape
    is_down = cols < rows
    if not old_params:
        if is_down:
            Q, _ = jnp.linalg.qr(jax.random.normal(key, shape, jnp.float32),
                                 mode="reduced")
            return Q
        else:
            Q, _ = jnp.linalg.qr(jax.random.normal(key, shape, jnp.float32).T,
                                 mode="reduced")
            return Q.T
    if is_down:
        V = jnp.concatenate(old_params, axis=1)                 # (in_dim, k)
        R = jax.random.normal(key, shape, jnp.float32)
        VTV = V.T @ V
        reg = 1e-6 * jnp.eye(VTV.shape[0], dtype=jnp.float32)
        proj = V @ jnp.linalg.solve(VTV + reg, V.T @ R)
        R_orth = R - proj
        Q, _ = jnp.linalg.qr(R_orth)
        return Q
    else:
        U = jnp.concatenate(old_params, axis=0)                 # (k, in_dim)
        R = jax.random.normal(key, shape, jnp.float32)
        UUT = U @ U.T
        reg = 1e-6 * jnp.eye(UUT.shape[0], dtype=jnp.float32)
        proj = R @ U.T @ jnp.linalg.solve(UUT + reg, U)
        R_orth = R - proj
        Q_t, _ = jnp.linalg.qr(R_orth.T, mode="reduced")
        return Q_t.T


def build_adapter_params(key, in_dim, hidden_dim, num_tasks):
    """Simulates num_tasks calls to add_new_task(); returns concatenated
    W_dp (in_dim, hidden_dim*num_tasks) and W_up (hidden_dim*num_tasks, in_dim)."""
    downs, ups = [], []
    for _ in range(num_tasks):
        k_d, k_u, key = jax.random.split(key, 3)
        downs.append(qr_init(k_d, (in_dim, hidden_dim), downs))
        ups.append(qr_init(k_u, (hidden_dim, in_dim), ups))
    W_dp = jnp.concatenate(downs, axis=1)
    W_up = jnp.concatenate(ups, axis=0)
    return W_dp, W_up


# ----------------------------------------------------------------------------
# Pallas kernel: relu(x_tile @ W_dp) @ W_up  (2 MXU matmuls + VPU relu)
# ----------------------------------------------------------------------------
def adapter_kernel(x_ref, wdp_ref, wup_ref, o_ref):
    h = jnp.dot(x_ref[...], wdp_ref[...], preferred_element_type=jnp.float32)
    h = jnp.maximum(h, 0.0)                                     # ReLU in f32
    out = jnp.dot(h.astype(wup_ref.dtype), wup_ref[...],
                  preferred_element_type=jnp.float32)
    o_ref[...] = out.astype(o_ref.dtype)


def adapter_forward(x, W_dp, W_up, *, compute_dtype=jnp.bfloat16):
    """x: (..., in_dim). Returns same shape / dtype as x."""
    orig_shape = x.shape
    out_dtype = x.dtype
    D = orig_shape[-1]
    H = W_dp.shape[1]
    M = 1
    for s in orig_shape[:-1]:
        M *= s

    # Lane-align to 128 (lane-dense vst / MXU-friendly K,N); pad with zeros,
    # which is exact for this op (zero rows/cols contribute nothing, relu(0)=0).
    D_pad = _round_up(D, 128)
    H_pad = _round_up(H, 128)

    cbytes = jnp.dtype(compute_dtype).itemsize
    obytes = jnp.dtype(out_dtype).itemsize
    weights_bytes = 2 * D_pad * H_pad * cbytes

    def footprint(tm):
        # resident weights + 2x double-buffered x / out tiles + f32 intermediate
        io = tm * D_pad * cbytes + tm * D_pad * obytes
        return weights_bytes + 2 * io + tm * H_pad * 4

    vmem_budget = 40 * 1024 * 1024
    tm = min(512, _round_up(M, 8))
    while tm > 8 and tm % 16 == 0 and footprint(tm) > vmem_budget:
        tm //= 2
    M_pad = _round_up(M, tm)

    x2 = x.reshape(M, D)
    x2 = jnp.pad(x2, ((0, M_pad - M), (0, D_pad - D))).astype(compute_dtype)
    Wdp = jnp.pad(W_dp, ((0, D_pad - D), (0, H_pad - H))).astype(compute_dtype)
    Wup = jnp.pad(W_up, ((0, H_pad - H), (0, D_pad - D))).astype(compute_dtype)

    grid = (M_pad // tm,)

    cost = pl.CostEstimate(
        flops=4 * M_pad * D_pad * H_pad,
        transcendentals=0,
        bytes_accessed=(x2.size + Wdp.size + Wup.size) * cbytes
        + M_pad * D_pad * obytes,
    )

    vmem_limit = int(min(56 * 1024 * 1024,
                         max(32 * 1024 * 1024, footprint(tm) + (8 << 20))))

    out2 = pl.pallas_call(
        adapter_kernel,
        out_shape=jax.ShapeDtypeStruct((M_pad, D_pad), out_dtype),
        grid_spec=pl.GridSpec(
            grid=grid,
            in_specs=[
                pl.BlockSpec((tm, D_pad), lambda i: (i, 0)),     # x tile
                pl.BlockSpec((D_pad, H_pad), lambda i: (0, 0)),  # W_dp resident
                pl.BlockSpec((H_pad, D_pad), lambda i: (0, 0)),  # W_up resident
            ],
            out_specs=pl.BlockSpec((tm, D_pad), lambda i: (i, 0)),
        ),
        compiler_params=pltpu.CompilerParams(
            dimension_semantics=("parallel",),
            vmem_limit_bytes=vmem_limit,
        ),
        cost_estimate=cost,
    )(x2, Wdp, Wup)

    return out2[:M, :D].reshape(orig_shape)


# ----------------------------------------------------------------------------
# Main: deterministic small-shape smoke test
# ----------------------------------------------------------------------------
if __name__ == "__main__":
    key = jax.random.PRNGKey(0)
    batch, seq, in_dim, hidden_dim, num_tasks = 2, 8, 32, 8, 2

    k_x, k_p = jax.random.split(key)
    x = jax.random.normal(k_x, (batch, seq, in_dim), jnp.float32)
    W_dp, W_up = build_adapter_params(k_p, in_dim, hidden_dim, num_tasks)

    # Pure-JAX reference
    ref = jnp.maximum(x @ W_dp, 0.0) @ W_up

    # fp32 path: tight-tolerance correctness check
    out_f32 = jax.block_until_ready(
        adapter_forward(x, W_dp, W_up, compute_dtype=jnp.float32))
    assert out_f32.shape == x.shape
    assert jnp.allclose(out_f32, ref, atol=1e-5, rtol=1e-5), "fp32 mismatch"

    # default bf16-input / f32-accumulate path (fast MXU path on v6e/v7x)
    out_bf16 = jax.block_until_ready(adapter_forward(x, W_dp, W_up))
    assert out_bf16.shape == x.shape
    assert jnp.allclose(out_bf16, ref, atol=5e-2, rtol=5e-2), "bf16 mismatch"

    print("KERNEL_OK")
</pallas_src>

<mosaic_0001>
module attributes {stable_mosaic.version = 11 : i64} {
  func.func @adapter_kernel(%arg0: i32, %arg1: memref<16x128xf32, #tpu.memory_space<vmem>>, %arg2: memref<128x128xf32, #tpu.memory_space<vmem>>, %arg3: memref<128x128xf32, #tpu.memory_space<vmem>>, %arg4: memref<16x128xf32, #tpu.memory_space<vmem>>) attributes {dimension_semantics = [#tpu.dimension_semantics<parallel>], iteration_bounds = array<i64: 1>, scalar_prefetch = 0 : i64, scratch_operands = 0 : i64, tpu.core_type = #tpu.core_type<tc>, window_params = [{transform_indices = @transform_0, window_bounds = array<i64: 16, 128>}, {pipeline_mode = #tpu.pipeline_mode<synchronous>, transform_indices = @transform_1, window_bounds = array<i64: 128, 128>}, {pipeline_mode = #tpu.pipeline_mode<synchronous>, transform_indices = @transform_2, window_bounds = array<i64: 128, 128>}, {transform_indices = @transform_3, window_bounds = array<i64: 16, 128>}]} {
    %c0 = arith.constant 0 : index
    %c0_0 = arith.constant 0 : index
    %0 = vector.load %arg1[%c0, %c0_0] : memref<16x128xf32, #tpu.memory_space<vmem>>, vector<16x128xf32>
    %c0_1 = arith.constant 0 : index
    %c0_2 = arith.constant 0 : index
    %1 = vector.load %arg2[%c0_1, %c0_2] : memref<128x128xf32, #tpu.memory_space<vmem>>, vector<128x128xf32>
    %cst = arith.constant dense<0.000000e+00> : vector<16x128xf32>
    %2 = tpu.matmul %0, %1, %cst {dimension_numbers = #tpu.dot_dimension_numbers<[1], [0], [0], [1], [0, 0, 1, 1], [], []>} : vector<16x128xf32>, vector<128x128xf32>, vector<16x128xf32> -> vector<16x128xf32>
    %cst_3 = arith.constant 0.000000e+00 : f32
    %3 = vector.broadcast %cst_3 : f32 to vector<16x128xf32>
    %4 = arith.maximumf %2, %3 : vector<16x128xf32>
    %c0_4 = arith.constant 0 : index
    %c0_5 = arith.constant 0 : index
    %5 = vector.load %arg3[%c0_4, %c0_5] : memref<128x128xf32, #tpu.memory_space<vmem>>, vector<128x128xf32>
    %cst_6 = arith.constant dense<0.000000e+00> : vector<16x128xf32>
    %6 = tpu.matmul %4, %5, %cst_6 {dimension_numbers = #tpu.dot_dimension_numbers<[1], [0], [0], [1], [0, 0, 1, 1], [], []>} : vector<16x128xf32>, vector<128x128xf32>, vector<16x128xf32> -> vector<16x128xf32>
    %c0_7 = arith.constant 0 : index
    %c0_8 = arith.constant 0 : index
    %7 = vector.load %arg4[%c0_7, %c0_8] : memref<16x128xf32, #tpu.memory_space<vmem>>, vector<16x128xf32>
    tpu.vector_store %arg4[%c0_7, %c0_8], %6 {strides = array<i32>} : memref<16x128xf32, #tpu.memory_space<vmem>>, vector<16x128xf32>,
    return
  }
  func.func @transform_0(%arg0: i32) -> (i32, i32) {
    %c0_i32 = arith.constant 0 : i32
    %c0_i32_0 = arith.constant 0 : i32
    return %arg0, %c0_i32 : i32, i32
  }
  func.func @transform_1(%arg0: i32) -> (i32, i32) {
    %c0_i32 = arith.constant 0 : i32
    %c0_i32_0 = arith.constant 0 : i32
    %c0_i32_1 = arith.constant 0 : i32
    return %c0_i32, %c0_i32_0 : i32, i32
  }
  func.func @transform_2(%arg0: i32) -> (i32, i32) {
    %c0_i32 = arith.constant 0 : i32
    %c0_i32_0 = arith.constant 0 : i32
    %c0_i32_1 = arith.constant 0 : i32
    return %c0_i32, %c0_i32_0 : i32, i32
  }
  func.func @transform_3(%arg0: i32) -> (i32, i32) {
    %c0_i32 = arith.constant 0 : i32
    %c0_i32_0 = arith.constant 0 : i32
    return %arg0, %c0_i32 : i32, i32
  }
}

</mosaic_0001>

<bundles_post_ra>
// kernel: tpu_custom_call.1
= control target key start
LH: loop header
LB: loop body
LE: loop exit
PB: predicated region body
PF: predicated region fallthrough
CT: control target
= control target key end

     0   :  { %8 = vsyncpa [#allocation3], 0  ;;  %s625_s0 = inlined_call_operand.hbm [shape: f32[16,128], index: 0, kind: input, shape index: {}]   ;;  %s626_s1 = inlined_call_operand.hbm [shape: f32[128,128], index: 1, kind: input, shape index: {}]   ;;  %s627_s2 = inlined_call_operand.hbm [shape: f32[128,128], index: 2, kind: input, shape index: {}]   ;;  %s628_s3 = inlined_call_operand.hbm [shape: f32[16,128], index: 3, kind: output, shape index: {}]  }
   0x1   :  { %9 = vsyncpa [#allocation6], 0 }
   0x2   :  { %10 = vsyncpa [#allocation4], 0  ;;  %s532_s12 = smov [#allocation5]   ;;  %s533_s14 = smov [#allocation2]  }
   0x3   :  { %s28_s13 = sshll.u32 %s532_s12, 4  ;;  %s16_s15 = sshll.u32 %s533_s14, 4  ;;  %s29_s13 = int_to_ptr.vmem [resolvable:$true] %s28_s13  ;;  %s558_s15 = int_to_ptr.vmem [resolvable:$true] %s16_s15 }
   0x4   :  { %s438_s18 = scalar_lea.hbm %s626_s1, 2048 }
   0x5   :  { %p439_p0 = scmp.ne.s32.totalorder %s626_s1, %s438_s18  ;;  %p442_p1 = scmp.lt.u32.totalorder %s438_s18, %s626_s1 }
   0x7   :  { %p444_p2 = pnand %p442_p1, %p439_p0 }
   0x9   :  { %447 = shalt.err (!%p444_p2)
}
   0xa   :  { %s448_s23 = scalar_lea.vmem %s29_s13, 2048  ;;  %p453_p4 = scmp.lt.s32.totalorder %s29_s13, %s29_s13 }
   0xb   :  { %p449_p3 = scmp.ne.s32.totalorder %s29_s13, %s448_s23  ;;  %p454_p5 = scmp.lt.s32.totalorder %s448_s23, %s448_s23 }
   0xd   :  { %p455_p6 = por %p454_p5, %p453_p4 }
   0xf   :  { %p456_p7 = pnand %p455_p6, %p449_p3 }
  0x11   :  { %459 = shalt.err (!%p456_p7)
}
  0x12   :  { %s534_s24 = smov 128   ;;  %s535_s25 = smov 8  }
  0x13   :  { %34 = dma.hbm_to_vmem [thread:$0]  %s626_s1, 2048, %s29_s13, [#allocation6], %s534_s24, %s534_s24, %s535_s25  }
  0x14   :  { %s460_s30 = scalar_lea.hbm %s625_s0, 256 }
  0x15   :  { %p461_p8 = scmp.ne.s32.totalorder %s625_s0, %s460_s30  ;;  %p464_p9 = scmp.lt.u32.totalorder %s460_s30, %s625_s0 }
  0x17   :  { %p466_p10 = pnand %p464_p9, %p461_p8 }
  0x19   :  { %469 = shalt.err (!%p466_p10)
}
  0x1a   :  { %s470_s8 = scalar_lea.vmem %s558_s15, 256  ;;  %p475_p12 = scmp.lt.s32.totalorder %s558_s15, %s558_s15 }
  0x1b   :  { %p471_p11 = scmp.ne.s32.totalorder %s558_s15, %s470_s8  ;;  %p476_p13 = scmp.lt.s32.totalorder %s470_s8, %s470_s8 }
  0x1d   :  { %p477_p0 = por %p476_p13, %p475_p12 }
  0x1f   :  { %p478_p1 = pnand %p477_p0, %p471_p11 }
  0x21   :  { %481 = shalt.err (!%p478_p1)
}
  0x22   :  { %22 = dma.hbm_to_vmem [thread:$0]  %s625_s0, 256, %s558_s15, [#allocation3], %s534_s24, %s534_s24, %s535_s25  }
  0x23   :  { %s536_s10 = smov [#allocation7]   ;;  %s482_s14 = scalar_lea.hbm %s627_s2, 2048 }
  0x24   :  { %s40_s11 = sshll.u32 %s536_s10, 4  ;;  %p483_p2 = scmp.ne.s32.totalorder %s627_s2, %s482_s14  ;;  %s41_s11 = int_to_ptr.vmem [resolvable:$true] %s40_s11 }
  0x25   :  { %p486_p3 = scmp.lt.u32.totalorder %s482_s14, %s627_s2 }
  0x27   :  { %p488_p4 = pnand %p486_p3, %p483_p2 }
  0x29   :  { %491 = shalt.err (!%p488_p4)
}
  0x2a   :  { %s492_s20 = scalar_lea.vmem %s41_s11, 2048  ;;  %p497_p6 = scmp.lt.s32.totalorder %s41_s11, %s41_s11 }
  0x2b   :  { %p493_p5 = scmp.ne.s32.totalorder %s41_s11, %s492_s20  ;;  %p498_p7 = scmp.lt.s32.totalorder %s492_s20, %s492_s20 }
  0x2d   :  { %p499_p8 = por %p498_p7, %p497_p6 }
  0x2f   :  { %p500_p9 = pnand %p499_p8, %p493_p5 }
  0x31   :  { %503 = shalt.err (!%p500_p9)
}
  0x32   :  { %46 = dma.hbm_to_vmem [thread:$0]  %s627_s2, 2048, %s41_s11, [#allocation6], %s534_s24, %s534_s24, %s535_s25  }
  0x33   :  { %526 = dma.done.wait [#allocation3], 256  }
  0x34   :  { %527 = vsyncadd [#allocation3], 4294967040 }
  0x35   :  { %528 = dma.done.wait [#allocation6], 4096  }
  0x36   :  { %529 = vsyncadd [#allocation6], 4294963200  ;;  %v58_v0 = vld [vmem:[#allocation5] sm:$0xff]  ;;  %v59_v1 = vld [vmem:[#allocation5 + $0x8] sm:$0xff]  ;;  %s537_s2 = smov [#allocation8]  }
  0x37   :  { %v60_v2 = vld [vmem:[#allocation5 + $0x10] sm:$0xff]  ;;  %v368_v3 = vpack.c.bf16 %v59_v1, %v58_v0  ;;  %v61_v4 = vld [vmem:[#allocation5 + $0x18] sm:$0xff]  ;;  %v62_v6 = vld [vmem:[#allocation5 + $0x20] sm:$0xff]  ;;  %s249_s21 = sshll.u32 %s537_s2, 4  ;;  %s250_s21 = int_to_ptr.vmem [resolvable:$true] %s249_s21 }
  0x38   :  { %v372_v5 = vpack.c.bf16 %v61_v4, %v60_v2  ;;  %v63_v7 = vld [vmem:[#allocation5 + $0x28] sm:$0xff]  ;;  %v64_v9 = vld [vmem:[#allocation5 + $0x30] sm:$0xff]  ;;  %v65_v10 = vld [vmem:[#allocation5 + $0x38] sm:$0xff]  ;;  %s504_s22 = scalar_lea.vmem %s250_s21, 256  ;;  %p509_p11 = scmp.lt.s32.totalorder %s250_s21, %s250_s21 }
  0x39   :  { %369 = vmatprep.subr.bf16.mxu0 %v368_v3  ;;  %v376_v8 = vpack.c.bf16 %v63_v7, %v62_v6  ;;  %v56_v11 = vld [vmem:[#allocation2] sm:$0xff]  ;;  %v151_v12 = vld [vmem:[#allocation7] sm:$0xff]  ;;  %v152_v13 = vld [vmem:[#allocation7 + $0x8] sm:$0xff]  ;;  %v380_v20 = vpack.c.bf16 %v65_v10, %v64_v9  ;;  %p505_p10 = scmp.ne.s32.totalorder %s250_s21, %s504_s22  ;;  %p510_p12 = scmp.lt.s32.totalorder %s504_s22, %s504_s22 }
  0x3a   :  { %371 = vmatpush3.bf16.msra.mxu0 %v368_v3  ;;  %330 = vmatprep.mubr.f32.mxu0 %v56_v11  ;;  %v153_v14 = vld [vmem:[#allocation7 + $0x10] sm:$0xff]  ;;  %v400_v15 = vpack.c.bf16 %v152_v13, %v151_v12  ;;  %v154_v16 = vld [vmem:[#allocation7 + $0x18] sm:$0xff]  ;;  %v155_v18 = vld [vmem:[#allocation7 + $0x20] sm:$0xff] }
  0x3b   :  { %373 = vmatprep.subr.bf16.mxu0 %v372_v5  ;;  %v404_v17 = vpack.c.bf16 %v154_v16, %v153_v14  ;;  %v156_v19 = vld [vmem:[#allocation7 + $0x28] sm:$0xff]  ;;  %v66_v21 = vld [vmem:[#allocation5 + $0x40] sm:$0xff]  ;;  %v157_v24 = vld [vmem:[#allocation7 + $0x30] sm:$0xff]  ;;  %p511_p13 = por %p510_p12, %p509_p11 }
  0x3c   :  { %401 = vmatprep.subr.bf16.mxu1 %v400_v15  ;;  %v67_v22 = vld [vmem:[#allocation5 + $0x48] sm:$0xff]  ;;  %v408_v23 = vpack.c.bf16 %v156_v19, %v155_v18  ;;  %v158_v25 = vld [vmem:[#allocation7 + $0x38] sm:$0xff]  ;;  %v68_v27 = vld [vmem:[#allocation5 + $0x50] sm:$0xff] }
  0x3d   :  { %403 = vmatpush3.bf16.msra.mxu1 %v400_v15  ;;  %v384_v26 = vpack.c.bf16 %v67_v22, %v66_v21  ;;  %v69_v28 = vld [vmem:[#allocation5 + $0x58] sm:$0xff]  ;;  %v412_v29 = vpack.c.bf16 %v158_v25, %v157_v24  ;;  %v159_v30 = vld [vmem:[#allocation7 + $0x40] sm:$0xff]  ;;  %v160_v31 = vld [vmem:[#allocation7 + $0x48] sm:$0xff]  ;;  %p512_p0 = pnand %p511_p13, %p505_p10 }
  0x3e   :  { %375 = vmatpush3.bf16.msra.mxu0 %v372_v5  ;;  %405 = vmatprep.subr.bf16.mxu1 %v404_v17  ;;  %v388_v32 = vpack.c.bf16 %v69_v28, %v68_v27  ;;  %v70_v33 = vld [vmem:[#allocation5 + $0x60] sm:$0xff]  ;;  %v71_v34 = vld [vmem:[#allocation5 + $0x68] sm:$0xff]  ;;  %v416_v35 = vpack.c.bf16 %v160_v31, %v159_v30  ;;  %v161_v36 = vld [vmem:[#allocation7 + $0x50] sm:$0xff] }
  0x3f   :  { %377 = vmatprep.subr.bf16.mxu0 %v376_v8  ;;  %v162_v37 = vld [vmem:[#allocation7 + $0x58] sm:$0xff]  ;;  %v392_v38 = vpack.c.bf16 %v71_v34, %v70_v33  ;;  %v72_v39 = vld [vmem:[#allocation5 + $0x70] sm:$0xff]  ;;  %v163_v42 = vld [vmem:[#allocation7 + $0x60] sm:$0xff] }
  0x40   :  { %v73_v40 = vld [vmem:[#allocation5 + $0x78] sm:$0xff]  ;;  %v420_v41 = vpack.c.bf16 %v162_v37, %v161_v36  ;;  %v164_v43 = vld [vmem:[#allocation7 + $0x68] sm:$0xff]  ;;  %v165_v47 = vld [vmem:[#allocation7 + $0x70] sm:$0xff] }
  0x41   :  { %407 = vmatpush3.bf16.msra.mxu1 %v404_v17  ;;  %v396_v44 = vpack.c.bf16 %v73_v40, %v72_v39  ;;  %v424_v45 = vpack.c.bf16 %v164_v43, %v163_v42  ;;  %v57_v46 = vld [vmem:[#allocation2 + $0x8] sm:$0xff] }
  0x42   :  { %379 = vmatpush3.bf16.msra.mxu0 %v376_v8  ;;  %409 = vmatprep.subr.bf16.mxu1 %v408_v23  ;;  %v166_v48 = vld [vmem:[#allocation7 + $0x78] sm:$0xff] }
  0x43   :  { %381 = vmatprep.subr.bf16.mxu0 %v380_v20  ;;  %v428_v49 = vpack.c.bf16 %v166_v48, %v165_v47 }
  0x45   :  { %411 = vmatpush3.bf16.msra.mxu1 %v408_v23 }
  0x46   :  { %383 = vmatpush3.bf16.msra.mxu0 %v380_v20  ;;  %413 = vmatprep.subr.bf16.mxu1 %v412_v29 }
  0x47   :  { %385 = vmatprep.subr.bf16.mxu0 %v384_v26 }
  0x49   :  { %415 = vmatpush3.bf16.msra.mxu1 %v412_v29 }
  0x4a   :  { %387 = vmatpush3.bf16.msra.mxu0 %v384_v26  ;;  %417 = vmatprep.subr.bf16.mxu1 %v416_v35 }
  0x4b   :  { %389 = vmatprep.subr.bf16.mxu0 %v388_v32 }
  0x4d   :  { %419 = vmatpush3.bf16.msra.mxu1 %v416_v35 }
  0x4e   :  { %391 = vmatpush3.bf16.msra.mxu0 %v388_v32  ;;  %421 = vmatprep.subr.bf16.mxu1 %v420_v41 }
  0x4f   :  { %393 = vmatprep.subr.bf16.mxu0 %v392_v38 }
  0x51   :  { %423 = vmatpush3.bf16.msra.mxu1 %v420_v41 }
  0x52   :  { %395 = vmatpush3.bf16.msra.mxu0 %v392_v38  ;;  %425 = vmatprep.subr.bf16.mxu1 %v424_v45 }
  0x53   :  { %397 = vmatprep.subr.bf16.mxu0 %v396_v44 }
  0x55   :  { %427 = vmatpush3.bf16.msra.mxu1 %v424_v45 }
  0x56   :  { %399 = vmatpush3.bf16.msra.mxu0 %v396_v44  ;;  %429 = vmatprep.subr.bf16.mxu1 %v428_v49 }
  0x59   :  { %331 = vmatmul.mubr.f32.vlgmr.msra.gmra.mrb[0].mxu0 %v57_v46  ;;  %431 = vmatpush3.bf16.msra.mxu1 %v428_v49 }
 0x12c   :  { %v332_v50 = vpop.f32.mrb[0].mxu0 }
 0x12d   :  { %v140_v51 = vpop.f32.mrb[1].mxu0  ;;  %v150_v53 = vmax.f32 %v332_v50, 0.0 }
 0x12e   :  { %v149_v52 = vmax.f32 %v140_v51, 0.0 }
 0x130   :  { %365 = vmatprep.mubr.f32.mxu1 %v149_v52 }
 0x131   :  { %366 = vmatmul.mubr.f32.vlgmr.msra.gmra.mrb[0].mxu1 %v150_v53 }
 0x204   :  { %v367_v54 = vpop.f32.mrb[0].mxu1 }
 0x205   :  { %243 = vst [vmem:[#allocation8 + $0x8] sm:$0xff] %v367_v54  ;;  %v233_v55 = vpop.f32.mrb[1].mxu1 }
 0x206   :  { %242 = vst [vmem:[#allocation8] sm:$0xff] %v233_v55 }
 0x207   :  { %515 = shalt.err (!%p512_p0)
}
 0x208   :  { %s516_s27 = scalar_lea.hbm %s628_s3, 256 }
 0x209   :  { %p517_p1 = scmp.ne.s32.totalorder %s628_s3, %s516_s27  ;;  %p520_p2 = scmp.lt.u32.totalorder %s516_s27, %s628_s3 }
 0x20b   :  { %p522_p3 = pnand %p520_p2, %p517_p1 }
 0x20d   :  { %525 = shalt.err (!%p522_p3)
}
 0x20e   :  { %255 = dma.vmem_to_hbm [thread:$0]  %s250_s21, 256, %s628_s3, [#allocation4], %s534_s24, %s534_s24, %s535_s25  }
 0x20f   :  { %530 = dma.done.wait [#allocation4], 256  }
 0x210   :  { %531 = vsyncadd [#allocation4], 4294967040 }
 0x211   :  { %259 = vsyncpa [#allocation3], 1 }
 0x212   :  { %260 = vsyncpa [#allocation6], 1 }
 0x213   :  { %261 = vsyncpa [#allocation4], 1 }

</bundles_post_ra>
